<compile_context>
chip_gen: v7x
topology: tpu7x:2x2x1
jax: 0.10.0
libtpu: 0.0.40
codegen_flags: <defaults>
</compile_context>

<pallas_src>
import jax
import jax.numpy as jnp
from jax.experimental import pallas as pl
from jax.experimental.pallas import tpu as pltpu


LANE = 128
SUBLANE = 8
VMEM_LIMIT = 32 * 1024 * 1024   # scoped VMEM we ask Mosaic for
VMEM_BUDGET = 24 * 1024 * 1024  # what the tile-size heuristic is allowed to plan for


def _round_up(x, m):
    return (x + m - 1) // m * m


def _vae_forward_kernel(
    x_ref,        # [TB, D_in]   f32   flattened (NCHW row-major) input tile
    we1_ref,      # [D_in, Hd]   bf16  encoder layer-1 weight (in, out)
    be1_ref,      # [1, Hd]      f32
    we2mu_ref,    # [Hd, Zp]     f32   mu head    (cols [Z:Zp] are zero)
    be2mu_ref,    # [1, Zp]      f32
    we2lv_ref,    # [Hd, Zp]     f32   logvar head (cols [Z:Zp] are zero)
    be2lv_ref,    # [1, Zp]      f32
    eps_ref,      # [TB, Zp]     f32   reparameterization noise (pad cols zero)
    wd1_ref,      # [Zp, Hd]     f32   decoder layer-1 weight (pad rows zero)
    bd1_ref,      # [1, Hd]      f32
    wd2_ref,      # [Hd, D_in]   bf16  decoder layer-2 weight
    bd2_ref,      # [1, D_in]    f32
    recon_ref,    # [TB, D_in]   f32   decoded logits (unactivated)
    mu_ref,       # [TB, Zp]     f32
    logvar_ref,   # [TB, Zp]     f32
    z_ref,        # [TB, Zp]     f32
):
    # ---- encoder ----
    # bf16 x bf16 -> f32 on the MXU (weight already bf16; casting x is a cheap
    # VPU op, far smaller than the weight DMA it lets us halve).
    x_bf = x_ref[...].astype(jnp.bfloat16)
    h = jnp.dot(x_bf, we1_ref[...], preferred_element_type=jnp.float32) + be1_ref[...]
    h = jnp.maximum(h, 0.0)  # activation_fn (config['activation'] == 'relu')

    # Separate mu / logvar heads: the torch Linear(Hd -> 2Z) columns are
    # [mu | logvar] (chunk(2, dim=1)); splitting the weight preserves that
    # ordering and writes mu/logvar straight into their own 128-lane tiles
    # with zero cross-lane traffic.
    mu = jnp.dot(h, we2mu_ref[...], preferred_element_type=jnp.float32) + be2mu_ref[...]
    logvar = jnp.dot(h, we2lv_ref[...], preferred_element_type=jnp.float32) + be2lv_ref[...]

    # ---- isotropic-gaussian reparameterization (f32 VPU, exp on the EUP) ----
    z = mu + jnp.exp(0.5 * logvar) * eps_ref[...]

    # ---- decoder ----
    hd = jnp.dot(z, wd1_ref[...], preferred_element_type=jnp.float32) + bd1_ref[...]
    hd = jnp.maximum(hd, 0.0)
    recon = (
        jnp.dot(hd.astype(jnp.bfloat16), wd2_ref[...], preferred_element_type=jnp.float32)
        + bd2_ref[...]
    )

    # Lane-dense (Zp = 128, D_in equals full array dim) and sublane-dense
    # (TB % 8 == 0) stores -> unmasked vst.
    recon_ref[...] = recon
    mu_ref[...] = mu
    logvar_ref[...] = logvar
    z_ref[...] = z


def init_params(key, d_in, hidden, z_dim):
    """Torch-layout f32 parameters (weights already transposed to [in, out])."""
    ks = jax.random.split(key, 8)
    s = lambda fan_in: 1.0 / jnp.sqrt(fan_in)
    return {
        "we1": jax.random.normal(ks[0], (d_in, hidden), jnp.float32) * s(d_in),
        "be1": jax.random.normal(ks[1], (1, hidden), jnp.float32) * 0.01,
        "we2": jax.random.normal(ks[2], (hidden, 2 * z_dim), jnp.float32) * s(hidden),
        "be2": jax.random.normal(ks[3], (1, 2 * z_dim), jnp.float32) * 0.01,
        "wd1": jax.random.normal(ks[4], (z_dim, hidden), jnp.float32) * s(z_dim),
        "bd1": jax.random.normal(ks[5], (1, hidden), jnp.float32) * 0.01,
        "wd2": jax.random.normal(ks[6], (hidden, d_in), jnp.float32) * s(hidden),
        "bd2": jax.random.normal(ks[7], (1, d_in), jnp.float32) * 0.01,
    }


def prepare_params(params, z_dim):
    """One-time layout transform into kernel layout (run outside the hot path).

    - dominant weights (we1, wd2) -> bfloat16 (halves their HBM traffic)
    - we2/be2 split into mu / logvar heads, lane-padded to 128
    - wd1 zero-padded on the latent axis to match the padded z
    """
    zp = _round_up(z_dim, LANE)
    pad_lane = lambda a: jnp.pad(a, ((0, 0), (0, zp - z_dim)))
    we2, be2 = params["we2"], params["be2"]
    return {
        "we1": params["we1"].astype(jnp.bfloat16),
        "be1": params["be1"].astype(jnp.float32),
        "we2_mu": pad_lane(we2[:, :z_dim]).astype(jnp.float32),
        "be2_mu": pad_lane(be2[:, :z_dim]).astype(jnp.float32),
        "we2_lv": pad_lane(we2[:, z_dim:]).astype(jnp.float32),
        "be2_lv": pad_lane(be2[:, z_dim:]).astype(jnp.float32),
        "wd1": jnp.pad(params["wd1"], ((0, zp - z_dim), (0, 0))).astype(jnp.float32),
        "bd1": params["bd1"].astype(jnp.float32),
        "wd2": params["wd2"].astype(jnp.bfloat16),
        "bd2": params["bd2"].astype(jnp.float32),
    }


def _weight_bytes(kparams):
    b = 0
    for k, v in kparams.items():
        b += v.size * v.dtype.itemsize
    return b


def _choose_batch_tile(b_pad, d_in, zp, kparams):
    """Largest batch tile (<=128 rows, multiple of 8) whose double-buffered
    per-tile streams + resident weights fit the VMEM budget."""
    # per-row bytes: x + recon (f32) plus eps/mu/logvar/z (f32, Zp lanes),
    # each double-buffered by the BlockSpec pipeline.
    per_row = 2 * (2 * d_in * 4 + 4 * zp * 4)
    resident = 2 * _weight_bytes(kparams)          # be safe: weights also 2-buffered
    avail = max(VMEM_BUDGET - resident - (1 << 20), per_row * SUBLANE)
    tb = min(128, avail // per_row)
    tb = max(SUBLANE, (tb // SUBLANE) * SUBLANE)
    return min(tb, b_pad)


def vae_forward(x_nchw, kparams, eps):
    """Fused VAE forward. Returns (decoded_logits [B,C,H,W], reparam dict)."""
    B, C, H, W = x_nchw.shape
    D_in = C * H * W
    Z = eps.shape[1]
    Hd = kparams["we1"].shape[1]
    Zp = kparams["we2_mu"].shape[1]

    # Batch padding / tiling: pad to a multiple of 8 sublanes; the tile size is
    # chosen from the VMEM budget so larger inputs pipeline (and shard across
    # v7x's two TensorCores) while the weights stay VMEM-resident (constant
    # block index across the grid).
    B_pad = _round_up(max(B, SUBLANE), SUBLANE)
    TB = _choose_batch_tile(B_pad, D_in, Zp, kparams)
    B_pad = _round_up(B_pad, TB)
    nb = B_pad // TB

    x_flat = x_nchw.reshape(B, D_in).astype(jnp.float32)  # matches torch .view(B, -1)
    x_flat = jnp.pad(x_flat, ((0, B_pad - B), (0, 0)))
    eps_p = jnp.pad(eps.astype(jnp.float32), ((0, B_pad - B), (0, Zp - Z)))

    batch_spec = lambda cols: pl.BlockSpec((TB, cols), lambda i: (i, 0))
    const_spec = lambda arr: pl.BlockSpec(arr.shape, lambda i: (0, 0))

    # Advisory roofline for XLA's scheduler.
    flops = 2 * B_pad * (D_in * Hd + 2 * Hd * Zp + Zp * Hd + Hd * D_in)
    bytes_accessed = (
        _weight_bytes(kparams)
        + x_flat.size * 4 + eps_p.size * 4
        + B_pad * D_in * 4 + 3 * B_pad * Zp * 4
    )
    cost = pl.CostEstimate(
        flops=flops, transcendentals=B_pad * Zp, bytes_accessed=bytes_accessed
    )

    out_shapes = (
        jax.ShapeDtypeStruct((B_pad, D_in), jnp.float32),  # decoded logits (flat)
        jax.ShapeDtypeStruct((B_pad, Zp), jnp.float32),    # mu (lane-padded)
        jax.ShapeDtypeStruct((B_pad, Zp), jnp.float32),    # logvar
        jax.ShapeDtypeStruct((B_pad, Zp), jnp.float32),    # z
    )

    recon_flat, mu_p, logvar_p, z_p = pl.pallas_call(
        _vae_forward_kernel,
        out_shape=out_shapes,
        grid=(nb,),
        in_specs=[
            batch_spec(D_in),                 # x
            const_spec(kparams["we1"]), const_spec(kparams["be1"]),
            const_spec(kparams["we2_mu"]), const_spec(kparams["be2_mu"]),
            const_spec(kparams["we2_lv"]), const_spec(kparams["be2_lv"]),
            batch_spec(Zp),                   # eps
            const_spec(kparams["wd1"]), const_spec(kparams["bd1"]),
            const_spec(kparams["wd2"]), const_spec(kparams["bd2"]),
        ],
        out_specs=(
            batch_spec(D_in),
            batch_spec(Zp),
            batch_spec(Zp),
            batch_spec(Zp),
        ),
        compiler_params=pltpu.CompilerParams(
            dimension_semantics=("parallel",),
            vmem_limit_bytes=VMEM_LIMIT,
        ),
        cost_estimate=cost,
    )(
        x_flat,
        kparams["we1"], kparams["be1"],
        kparams["we2_mu"], kparams["be2_mu"],
        kparams["we2_lv"], kparams["be2_lv"],
        eps_p,
        kparams["wd1"], kparams["bd1"],
        kparams["wd2"], kparams["bd2"],
    )

    decoded_logits = recon_flat[:B].reshape(B, C, H, W)
    reparam_params = {
        "gaussian": {"mu": mu_p[:B, :Z], "logvar": logvar_p[:B, :Z]},
        "z": z_p[:B, :Z],
    }
    # TODO(synk): EMA aggregate_posterior tracking and the mutual-info branch
    # (_compute_mi_params when continuous/discrete_mut_info > 0) are
    # training-time bookkeeping outside the forward hot path; omitted.
    return decoded_logits, reparam_params


def _ref_forward(x_nchw, params, eps):
    """Pure-JAX reference with identical bf16-at-the-dot numerics."""
    B = x_nchw.shape[0]
    Z = eps.shape[1]
    x = x_nchw.reshape(B, -1).astype(jnp.float32)
    h = jnp.maximum(
        jnp.dot(x.astype(jnp.bfloat16), params["we1"].astype(jnp.bfloat16),
                preferred_element_type=jnp.float32) + params["be1"], 0.0)
    zl = jnp.dot(h, params["we2"], preferred_element_type=jnp.float32) + params["be2"]
    mu, lv = zl[:, :Z], zl[:, Z:]
    z = mu + jnp.exp(0.5 * lv) * eps
    hd = jnp.maximum(
        jnp.dot(z, params["wd1"], preferred_element_type=jnp.float32) + params["bd1"], 0.0)
    recon = jnp.dot(hd.astype(jnp.bfloat16), params["wd2"].astype(jnp.bfloat16),
                    preferred_element_type=jnp.float32) + params["bd2"]
    return recon.reshape(x_nchw.shape), mu, lv, z


if __name__ == "__main__":
    # Small shapes consistent with the module's conv-image inputs.
    B, C, H, W = 2, 4, 16, 16
    Z = 16       # latent size
    HIDDEN = 32  # encoder/decoder hidden width

    key = jax.random.PRNGKey(0)
    k_x, k_eps, k_p = jax.random.split(key, 3)

    x = jax.random.normal(k_x, (B, C, H, W), jnp.float32)   # layout: NCHW
    eps = jax.random.normal(k_eps, (B, Z), jnp.float32)
    params = init_params(k_p, C * H * W, HIDDEN, Z)
    kparams = prepare_params(params, Z)   # one-time kernel-layout transform

    decoded_logits, reparam = vae_forward(x, kparams, eps)
    jax.block_until_ready((decoded_logits, reparam))

    assert decoded_logits.shape == (B, C, H, W)
    assert reparam["gaussian"]["mu"].shape == (B, Z)
    assert reparam["gaussian"]["logvar"].shape == (B, Z)
    assert reparam["z"].shape == (B, Z)

    # Correctness vs a pure-JAX reference using the same bf16-at-the-dot casts.
    r_rec, r_mu, r_lv, r_z = _ref_forward(x, params, eps)
    assert jnp.allclose(decoded_logits, r_rec, atol=2e-2, rtol=2e-2)
    assert jnp.allclose(reparam["gaussian"]["mu"], r_mu, atol=2e-2, rtol=2e-2)
    assert jnp.allclose(reparam["gaussian"]["logvar"], r_lv, atol=2e-2, rtol=2e-2)
    assert jnp.allclose(reparam["z"], r_z, atol=2e-2, rtol=2e-2)

    print("KERNEL_OK")
</pallas_src>

<mosaic_0001>
module attributes {stable_mosaic.version = 11 : i64} {
  func.func @_vae_forward_kernel(%arg0: i32, %arg1: memref<8x1024xf32, #tpu.memory_space<vmem>>, %arg2: memref<1024x32xbf16, #tpu.memory_space<vmem>>, %arg3: memref<1x32xf32, #tpu.memory_space<vmem>>, %arg4: memref<32x128xf32, #tpu.memory_space<vmem>>, %arg5: memref<1x128xf32, #tpu.memory_space<vmem>>, %arg6: memref<32x128xf32, #tpu.memory_space<vmem>>, %arg7: memref<1x128xf32, #tpu.memory_space<vmem>>, %arg8: memref<8x128xf32, #tpu.memory_space<vmem>>, %arg9: memref<128x32xf32, #tpu.memory_space<vmem>>, %arg10: memref<1x32xf32, #tpu.memory_space<vmem>>, %arg11: memref<32x1024xbf16, #tpu.memory_space<vmem>>, %arg12: memref<1x1024xf32, #tpu.memory_space<vmem>>, %arg13: memref<8x1024xf32, #tpu.memory_space<vmem>>, %arg14: memref<8x128xf32, #tpu.memory_space<vmem>>, %arg15: memref<8x128xf32, #tpu.memory_space<vmem>>, %arg16: memref<8x128xf32, #tpu.memory_space<vmem>>) attributes {dimension_semantics = [#tpu.dimension_semantics<parallel>], iteration_bounds = array<i64: 1>, scalar_prefetch = 0 : i64, scratch_operands = 0 : i64, tpu.core_type = #tpu.core_type<tc>, window_params = [{transform_indices = @transform_0, window_bounds = array<i64: 8, 1024>}, {pipeline_mode = #tpu.pipeline_mode<synchronous>, transform_indices = @transform_1, window_bounds = array<i64: 1024, 32>}, {pipeline_mode = #tpu.pipeline_mode<synchronous>, transform_indices = @transform_2, window_bounds = array<i64: 1, 32>}, {pipeline_mode = #tpu.pipeline_mode<synchronous>, transform_indices = @transform_3, window_bounds = array<i64: 32, 128>}, {pipeline_mode = #tpu.pipeline_mode<synchronous>, transform_indices = @transform_4, window_bounds = array<i64: 1, 128>}, {pipeline_mode = #tpu.pipeline_mode<synchronous>, transform_indices = @transform_5, window_bounds = array<i64: 32, 128>}, {pipeline_mode = #tpu.pipeline_mode<synchronous>, transform_indices = @transform_6, window_bounds = array<i64: 1, 128>}, {transform_indices = @transform_7, window_bounds = array<i64: 8, 128>}, {pipeline_mode = #tpu.pipeline_mode<synchronous>, transform_indices = @transform_8, window_bounds = array<i64: 128, 32>}, {pipeline_mode = #tpu.pipeline_mode<synchronous>, transform_indices = @transform_9, window_bounds = array<i64: 1, 32>}, {pipeline_mode = #tpu.pipeline_mode<synchronous>, transform_indices = @transform_10, window_bounds = array<i64: 32, 1024>}, {pipeline_mode = #tpu.pipeline_mode<synchronous>, transform_indices = @transform_11, window_bounds = array<i64: 1, 1024>}, {transform_indices = @transform_12, window_bounds = array<i64: 8, 1024>}, {transform_indices = @transform_13, window_bounds = array<i64: 8, 128>}, {transform_indices = @transform_14, window_bounds = array<i64: 8, 128>}, {transform_indices = @transform_15, window_bounds = array<i64: 8, 128>}]} {
    %c0 = arith.constant 0 : index
    %c0_0 = arith.constant 0 : index
    %0 = vector.load %arg1[%c0, %c0_0] : memref<8x1024xf32, #tpu.memory_space<vmem>>, vector<8x1024xf32>
    %1 = arith.truncf %0 : vector<8x1024xf32> to vector<8x1024xbf16>
    %c0_1 = arith.constant 0 : index
    %c0_2 = arith.constant 0 : index
    %2 = vector.load %arg2[%c0_1, %c0_2] : memref<1024x32xbf16, #tpu.memory_space<vmem>>, vector<1024x32xbf16>
    %cst = arith.constant dense<0.000000e+00> : vector<8x32xf32>
    %3 = tpu.matmul %1, %2, %cst {dimension_numbers = #tpu.dot_dimension_numbers<[1], [0], [0], [1], [0, 0, 1, 1], [], []>} : vector<8x1024xbf16>, vector<1024x32xbf16>, vector<8x32xf32> -> vector<8x32xf32>
    %c0_3 = arith.constant 0 : index
    %c0_4 = arith.constant 0 : index
    %4 = vector.load %arg3[%c0_3, %c0_4] : memref<1x32xf32, #tpu.memory_space<vmem>>, vector<1x32xf32>
    %5 = vector.broadcast %4 : vector<1x32xf32> to vector<8x32xf32>
    %6 = arith.addf %3, %5 : vector<8x32xf32>
    %cst_5 = arith.constant 0.000000e+00 : f32
    %7 = vector.broadcast %cst_5 : f32 to vector<8x32xf32>
    %8 = arith.maximumf %6, %7 : vector<8x32xf32>
    %c0_6 = arith.constant 0 : index
    %c0_7 = arith.constant 0 : index
    %9 = vector.load %arg4[%c0_6, %c0_7] : memref<32x128xf32, #tpu.memory_space<vmem>>, vector<32x128xf32>
    %cst_8 = arith.constant dense<0.000000e+00> : vector<8x128xf32>
    %10 = tpu.matmul %8, %9, %cst_8 {dimension_numbers = #tpu.dot_dimension_numbers<[1], [0], [0], [1], [0, 0, 1, 1], [], []>} : vector<8x32xf32>, vector<32x128xf32>, vector<8x128xf32> -> vector<8x128xf32>
    %c0_9 = arith.constant 0 : index
    %c0_10 = arith.constant 0 : index
    %11 = vector.load %arg5[%c0_9, %c0_10] : memref<1x128xf32, #tpu.memory_space<vmem>>, vector<1x128xf32>
    %12 = vector.broadcast %11 : vector<1x128xf32> to vector<8x128xf32>
    %13 = arith.addf %10, %12 : vector<8x128xf32>
    %c0_11 = arith.constant 0 : index
    %c0_12 = arith.constant 0 : index
    %14 = vector.load %arg6[%c0_11, %c0_12] : memref<32x128xf32, #tpu.memory_space<vmem>>, vector<32x128xf32>
    %cst_13 = arith.constant dense<0.000000e+00> : vector<8x128xf32>
    %15 = tpu.matmul %8, %14, %cst_13 {dimension_numbers = #tpu.dot_dimension_numbers<[1], [0], [0], [1], [0, 0, 1, 1], [], []>} : vector<8x32xf32>, vector<32x128xf32>, vector<8x128xf32> -> vector<8x128xf32>
    %c0_14 = arith.constant 0 : index
    %c0_15 = arith.constant 0 : index
    %16 = vector.load %arg7[%c0_14, %c0_15] : memref<1x128xf32, #tpu.memory_space<vmem>>, vector<1x128xf32>
    %17 = vector.broadcast %16 : vector<1x128xf32> to vector<8x128xf32>
    %18 = arith.addf %15, %17 : vector<8x128xf32>
    %cst_16 = arith.constant 5.000000e-01 : f32
    %19 = vector.broadcast %cst_16 : f32 to vector<8x128xf32>
    %20 = arith.mulf %19, %18 : vector<8x128xf32>
    %21 = math.exp %20 : vector<8x128xf32>
    %c0_17 = arith.constant 0 : index
    %c0_18 = arith.constant 0 : index
    %22 = vector.load %arg8[%c0_17, %c0_18] : memref<8x128xf32, #tpu.memory_space<vmem>>, vector<8x128xf32>
    %23 = arith.mulf %21, %22 : vector<8x128xf32>
    %24 = arith.addf %13, %23 : vector<8x128xf32>
    %c0_19 = arith.constant 0 : index
    %c0_20 = arith.constant 0 : index
    %25 = vector.load %arg9[%c0_19, %c0_20] : memref<128x32xf32, #tpu.memory_space<vmem>>, vector<128x32xf32>
    %cst_21 = arith.constant dense<0.000000e+00> : vector<8x32xf32>
    %26 = tpu.matmul %24, %25, %cst_21 {dimension_numbers = #tpu.dot_dimension_numbers<[1], [0], [0], [1], [0, 0, 1, 1], [], []>} : vector<8x128xf32>, vector<128x32xf32>, vector<8x32xf32> -> vector<8x32xf32>
    %c0_22 = arith.constant 0 : index
    %c0_23 = arith.constant 0 : index
    %27 = vector.load %arg10[%c0_22, %c0_23] : memref<1x32xf32, #tpu.memory_space<vmem>>, vector<1x32xf32>
    %28 = vector.broadcast %27 : vector<1x32xf32> to vector<8x32xf32>
    %29 = arith.addf %26, %28 : vector<8x32xf32>
    %cst_24 = arith.constant 0.000000e+00 : f32
    %30 = vector.broadcast %cst_24 : f32 to vector<8x32xf32>
    %31 = arith.maximumf %29, %30 : vector<8x32xf32>
    %32 = arith.truncf %31 : vector<8x32xf32> to vector<8x32xbf16>
    %c0_25 = arith.constant 0 : index
    %c0_26 = arith.constant 0 : index
    %33 = vector.load %arg11[%c0_25, %c0_26] : memref<32x1024xbf16, #tpu.memory_space<vmem>>, vector<32x1024xbf16>
    %cst_27 = arith.constant dense<0.000000e+00> : vector<8x1024xf32>
    %34 = tpu.matmul %32, %33, %cst_27 {dimension_numbers = #tpu.dot_dimension_numbers<[1], [0], [0], [1], [0, 0, 1, 1], [], []>} : vector<8x32xbf16>, vector<32x1024xbf16>, vector<8x1024xf32> -> vector<8x1024xf32>
    %c0_28 = arith.constant 0 : index
    %c0_29 = arith.constant 0 : index
    %35 = vector.load %arg12[%c0_28, %c0_29] : memref<1x1024xf32, #tpu.memory_space<vmem>>, vector<1x1024xf32>
    %36 = vector.broadcast %35 : vector<1x1024xf32> to vector<8x1024xf32>
    %37 = arith.addf %34, %36 : vector<8x1024xf32>
    %c0_30 = arith.constant 0 : index
    %c0_31 = arith.constant 0 : index
    %38 = vector.load %arg13[%c0_30, %c0_31] : memref<8x1024xf32, #tpu.memory_space<vmem>>, vector<8x1024xf32>
    tpu.vector_store %arg13[%c0_30, %c0_31], %37 {strides = array<i32>} : memref<8x1024xf32, #tpu.memory_space<vmem>>, vector<8x1024xf32>,
    %c0_32 = arith.constant 0 : index
    %c0_33 = arith.constant 0 : index
    %39 = vector.load %arg14[%c0_32, %c0_33] : memref<8x128xf32, #tpu.memory_space<vmem>>, vector<8x128xf32>
    tpu.vector_store %arg14[%c0_32, %c0_33], %13 {strides = array<i32>} : memref<8x128xf32, #tpu.memory_space<vmem>>, vector<8x128xf32>,
    %c0_34 = arith.constant 0 : index
    %c0_35 = arith.constant 0 : index
    %40 = vector.load %arg15[%c0_34, %c0_35] : memref<8x128xf32, #tpu.memory_space<vmem>>, vector<8x128xf32>
    tpu.vector_store %arg15[%c0_34, %c0_35], %18 {strides = array<i32>} : memref<8x128xf32, #tpu.memory_space<vmem>>, vector<8x128xf32>,
    %c0_36 = arith.constant 0 : index
    %c0_37 = arith.constant 0 : index
    %41 = vector.load %arg16[%c0_36, %c0_37] : memref<8x128xf32, #tpu.memory_space<vmem>>, vector<8x128xf32>
    tpu.vector_store %arg16[%c0_36, %c0_37], %24 {strides = array<i32>} : memref<8x128xf32, #tpu.memory_space<vmem>>, vector<8x128xf32>,
    return
  }
  func.func @transform_0(%arg0: i32) -> (i32, i32) {
    %c0_i32 = arith.constant 0 : i32
    %c0_i32_0 = arith.constant 0 : i32
    return %arg0, %c0_i32 : i32, i32
  }
  func.func @transform_1(%arg0: i32) -> (i32, i32) {
    %c0_i32 = arith.constant 0 : i32
    %c0_i32_0 = arith.constant 0 : i32
    %c0_i32_1 = arith.constant 0 : i32
    return %c0_i32, %c0_i32_0 : i32, i32
  }
  func.func @transform_2(%arg0: i32) -> (i32, i32) {
    %c0_i32 = arith.constant 0 : i32
    %c0_i32_0 = arith.constant 0 : i32
    %c0_i32_1 = arith.constant 0 : i32
    return %c0_i32, %c0_i32_0 : i32, i32
  }
  func.func @transform_3(%arg0: i32) -> (i32, i32) {
    %c0_i32 = arith.constant 0 : i32
    %c0_i32_0 = arith.constant 0 : i32
    %c0_i32_1 = arith.constant 0 : i32
    return %c0_i32, %c0_i32_0 : i32, i32
  }
  func.func @transform_4(%arg0: i32) -> (i32, i32) {
    %c0_i32 = arith.constant 0 : i32
    %c0_i32_0 = arith.constant 0 : i32
    %c0_i32_1 = arith.constant 0 : i32
    return %c0_i32, %c0_i32_0 : i32, i32
  }
  func.func @transform_5(%arg0: i32) -> (i32, i32) {
    %c0_i32 = arith.constant 0 : i32
    %c0_i32_0 = arith.constant 0 : i32
    %c0_i32_1 = arith.constant 0 : i32
    return %c0_i32, %c0_i32_0 : i32, i32
  }
  func.func @transform_6(%arg0: i32) -> (i32, i32) {
    %c0_i32 = arith.constant 0 : i32
    %c0_i32_0 = arith.constant 0 : i32
    %c0_i32_1 = arith.constant 0 : i32
    return %c0_i32, %c0_i32_0 : i32, i32
  }
  func.func @transform_7(%arg0: i32) -> (i32, i32) {
    %c0_i32 = arith.constant 0 : i32
    %c0_i32_0 = arith.constant 0 : i32
    return %arg0, %c0_i32 : i32, i32
  }
  func.func @transform_8(%arg0: i32) -> (i32, i32) {
    %c0_i32 = arith.constant 0 : i32
    %c0_i32_0 = arith.constant 0 : i32
    %c0_i32_1 = arith.constant 0 : i32
    return %c0_i32, %c0_i32_0 : i32, i32
  }
  func.func @transform_9(%arg0: i32) -> (i32, i32) {
    %c0_i32 = arith.constant 0 : i32
    %c0_i32_0 = arith.constant 0 : i32
    %c0_i32_1 = arith.constant 0 : i32
    return %c0_i32, %c0_i32_0 : i32, i32
  }
  func.func @transform_10(%arg0: i32) -> (i32, i32) {
    %c0_i32 = arith.constant 0 : i32
    %c0_i32_0 = arith.constant 0 : i32
    %c0_i32_1 = arith.constant 0 : i32
    return %c0_i32, %c0_i32_0 : i32, i32
  }
  func.func @transform_11(%arg0: i32) -> (i32, i32) {
    %c0_i32 = arith.constant 0 : i32
    %c0_i32_0 = arith.constant 0 : i32
    %c0_i32_1 = arith.constant 0 : i32
    return %c0_i32, %c0_i32_0 : i32, i32
  }
  func.func @transform_12(%arg0: i32) -> (i32, i32) {
    %c0_i32 = arith.constant 0 : i32
    %c0_i32_0 = arith.constant 0 : i32
    return %arg0, %c0_i32 : i32, i32
  }
  func.func @transform_13(%arg0: i32) -> (i32, i32) {
    %c0_i32 = arith.constant 0 : i32
    %c0_i32_0 = arith.constant 0 : i32
    return %arg0, %c0_i32 : i32, i32
  }
  func.func @transform_14(%arg0: i32) -> (i32, i32) {
    %c0_i32 = arith.constant 0 : i32
    %c0_i32_0 = arith.constant 0 : i32
    return %arg0, %c0_i32 : i32, i32
  }
  func.func @transform_15(%arg0: i32) -> (i32, i32) {
    %c0_i32 = arith.constant 0 : i32
    %c0_i32_0 = arith.constant 0 : i32
    return %arg0, %c0_i32 : i32, i32
  }
}

</mosaic_0001>

<bundles_post_ra>
// kernel: tpu_custom_call.1
= control target key start
LH: loop header
LB: loop body
LE: loop exit
PB: predicated region body
PF: predicated region fallthrough
CT: control target
= control target key end

     0   :  { %21 = vsyncpa [#allocation3], 0  ;;  %s2360_s0 = inlined_call_operand.vmem [shape: f32[8,1024], index: 0, kind: input, shape index: {}]   ;;  %s2361_s1 = inlined_call_operand.vmem [shape: bf16[1024,32], index: 1, kind: input, shape index: {}]   ;;  %s2362_s2 = inlined_call_operand.vmem [shape: f32[1,32], index: 2, kind: input, shape index: {}]   ;;  %s2363_s3 = inlined_call_operand.vmem [shape: f32[32,128], index: 3, kind: input, shape index: {}]   ;;  %s2364_s4 = inlined_call_operand.vmem [shape: f32[1,128], index: 4, kind: input, shape index: {}]   ;;  %s2365_s5 = inlined_call_operand.vmem [shape: f32[32,128], index: 5, kind: input, shape index: {}]   ;;  %s2366_s6 = inlined_call_operand.vmem [shape: f32[1,128], index: 6, kind: input, shape index: {}]   ;;  %s2367_s7 = inlined_call_operand.vmem [shape: f32[8,128], index: 7, kind: input, shape index: {}]   ;;  %s2368_s8 = inlined_call_operand.vmem [shape: f32[128,32], index: 8, kind: input, shape index: {}]   ;;  %s2369_s9 = inlined_call_operand.vmem [shape: f32[1,32], index: 9, kind: input, shape index: {}]   ;;  %s2370_s10 = inlined_call_operand.vmem [shape: bf16[32,1024], index: 10, kind: input, shape index: {}]   ;;  %s2371_s11 = inlined_call_operand.vmem [shape: f32[1,1024], index: 11, kind: input, shape index: {}]   ;;  %s2372_s12 = inlined_call_operand.hbm [shape: f32[8,1024], index: 12, kind: output, shape index: {0}]   ;;  %s2373_s13 = inlined_call_operand.hbm [shape: f32[8,128], index: 13, kind: output, shape index: {1}]   ;;  %s2374_s14 = inlined_call_operand.hbm [shape: f32[8,128], index: 14, kind: output, shape index: {2}]   ;;  %s2375_s15 = inlined_call_operand.hbm [shape: f32[8,128], index: 15, kind: output, shape index: {3}]  }
   0x1   :  { %22 = vsyncpa [#allocation5], 0  ;;  %v1689_v0 = vld [vmem:[%s2361_s1 + $0x40] sm:$0xff]   ;;  %v1693_v4 = vld [vmem:[%s2361_s1 + $0x48] sm:$0xff]  }
   0x2   :  { %v1690_v1 = vld [vmem:[%s2361_s1 + $0xc0] sm:$0xff]   ;;  %1473 = vmatprep.subr.bf16.mxu0 %v1689_v0  ;;  %v1694_v5 = vld [vmem:[%s2361_s1 + $0xc8] sm:$0xff]   ;;  %v1697_v8 = vld [vmem:[%s2361_s1 + $0x50] sm:$0xff]  }
   0x3   :  { %v1691_v2 = vld [vmem:[%s2361_s1] sm:$0xff]   ;;  %1495 = vmatprep.subr.bf16.mxu1 %v1690_v1  ;;  %v1695_v6 = vld [vmem:[%s2361_s1 + $0x8] sm:$0xff]   ;;  %v1698_v9 = vld [vmem:[%s2361_s1 + $0xd0] sm:$0xff]  }
   0x4   :  { %v1692_v3 = vld [vmem:[%s2361_s1 + $0x80] sm:$0xff]   ;;  %1474 = vmatpush3.bf16.msra.mxu0 %v1691_v2  ;;  %v1696_v7 = vld [vmem:[%s2361_s1 + $0x88] sm:$0xff]   ;;  %v1699_v10 = vld [vmem:[%s2361_s1 + $0x10] sm:$0xff]  }
   0x5   :  { %1496 = vmatpush3.bf16.msra.mxu1 %v1692_v3  ;;  %1475 = vmatprep.subr.bf16.mxu0 %v1693_v4  ;;  %v1700_v11 = vld [vmem:[%s2361_s1 + $0x90] sm:$0xff]   ;;  %v1701_v12 = vld [vmem:[%s2361_s1 + $0x58] sm:$0xff]   ;;  %v1705_v16 = vld [vmem:[%s2361_s1 + $0x60] sm:$0xff]  }
   0x6   :  { %1497 = vmatprep.subr.bf16.mxu1 %v1694_v5  ;;  %v1702_v13 = vld [vmem:[%s2361_s1 + $0xd8] sm:$0xff]   ;;  %v1706_v17 = vld [vmem:[%s2361_s1 + $0xe0] sm:$0xff]   ;;  %v1709_v20 = vld [vmem:[%s2361_s1 + $0x68] sm:$0xff]  }
   0x7   :  { %v1703_v14 = vld [vmem:[%s2361_s1 + $0x18] sm:$0xff]   ;;  %v1707_v18 = vld [vmem:[%s2361_s1 + $0x20] sm:$0xff]   ;;  %v1710_v21 = vld [vmem:[%s2361_s1 + $0xe8] sm:$0xff]  }
   0x8   :  { %1476 = vmatpush3.bf16.msra.mxu0 %v1695_v6  ;;  %v1704_v15 = vld [vmem:[%s2361_s1 + $0x98] sm:$0xff]   ;;  %v1708_v19 = vld [vmem:[%s2361_s1 + $0xa0] sm:$0xff]   ;;  %v1711_v22 = vld [vmem:[%s2361_s1 + $0x28] sm:$0xff]  }
   0x9   :  { %1498 = vmatpush3.bf16.msra.mxu1 %v1696_v7  ;;  %1477 = vmatprep.subr.bf16.mxu0 %v1697_v8  ;;  %v1712_v23 = vld [vmem:[%s2361_s1 + $0xa8] sm:$0xff]   ;;  %v1713_v24 = vld [vmem:[%s2361_s1 + $0x70] sm:$0xff]   ;;  %v1717_v28 = vld [vmem:[%s2361_s1 + $0x78] sm:$0xff]  }
   0xa   :  { %1499 = vmatprep.subr.bf16.mxu1 %v1698_v9  ;;  %v1714_v25 = vld [vmem:[%s2361_s1 + $0xf0] sm:$0xff]   ;;  %v1718_v29 = vld [vmem:[%s2361_s1 + $0xf8] sm:$0xff]   ;;  %v50_v32 = vld [vmem:[%s2360_s0 + $0x8] sm:$0xff] }
   0xb   :  { %v1715_v26 = vld [vmem:[%s2361_s1 + $0x30] sm:$0xff]   ;;  %v1719_v30 = vld [vmem:[%s2361_s1 + $0x38] sm:$0xff]   ;;  %v49_v34 = vld [vmem:[%s2360_s0] sm:$0xff]  ;;  %v58_v35 = vpack.c.bf16 %v50_v32, %v50_v32 }
   0xc   :  { %1478 = vmatpush3.bf16.msra.mxu0 %v1699_v10  ;;  %v1716_v27 = vld [vmem:[%s2361_s1 + $0xb0] sm:$0xff]   ;;  %v1720_v31 = vld [vmem:[%s2361_s1 + $0xb8] sm:$0xff]   ;;  %v57_v37 = vpack.c.bf16 %v49_v34, %v49_v34  ;;  %v1721_v40 = vld [vmem:[%s2361_s1 + $0x140] sm:$0xff]  }
   0xd   :  { %1500 = vmatpush3.bf16.msra.mxu1 %v1700_v11  ;;  %1479 = vmatprep.subr.bf16.mxu0 %v1701_v12  ;;  %v52_v33 = vld [vmem:[%s2360_s0 + $0x18] sm:$0xff]  ;;  %v51_v38 = vld [vmem:[%s2360_s0 + $0x10] sm:$0xff]  ;;  %v1722_v41 = vld [vmem:[%s2361_s1 + $0x1c0] sm:$0xff]  }
   0xe   :  { %1501 = vmatprep.subr.bf16.mxu1 %v1702_v13  ;;  %v60_v36 = vpack.c.bf16 %v52_v33, %v52_v33  ;;  %v59_v39 = vpack.c.bf16 %v51_v38, %v51_v38  ;;  %616 = vmatprep.mubr.bf16.mxu0 %v58_v35  ;;  %v1723_v42 = vld [vmem:[%s2361_s1 + $0x100] sm:$0xff]   ;;  %v1725_v44 = vld [vmem:[%s2361_s1 + $0x148] sm:$0xff]   ;;  %v1729_v48 = vld [vmem:[%s2361_s1 + $0x150] sm:$0xff]  }
   0xf   :  { %v1724_v43 = vld [vmem:[%s2361_s1 + $0x180] sm:$0xff]   ;;  %v1726_v45 = vld [vmem:[%s2361_s1 + $0x1c8] sm:$0xff]   ;;  %v1730_v49 = vld [vmem:[%s2361_s1 + $0x1d0] sm:$0xff]  }
  0x10   :  { %1480 = vmatpush3.bf16.msra.mxu0 %v1703_v14  ;;  %656 = vmatprep.mubr.bf16.mxu1 %v60_v36  ;;  %v1727_v46 = vld [vmem:[%s2361_s1 + $0x108] sm:$0xff]   ;;  %v1731_v50 = vld [vmem:[%s2361_s1 + $0x110] sm:$0xff]   ;;  %v1733_v52 = vld [vmem:[%s2361_s1 + $0x158] sm:$0xff]  }
  0x11   :  { %1502 = vmatpush3.bf16.msra.mxu1 %v1704_v15  ;;  %1481 = vmatprep.subr.bf16.mxu0 %v1705_v16  ;;  %v1728_v47 = vld [vmem:[%s2361_s1 + $0x188] sm:$0xff]   ;;  %v1732_v51 = vld [vmem:[%s2361_s1 + $0x190] sm:$0xff]   ;;  %v1734_v53 = vld [vmem:[%s2361_s1 + $0x1d8] sm:$0xff]  }
  0x12   :  { %1503 = vmatprep.subr.bf16.mxu1 %v1706_v17  ;;  %v1735_v54 = vld [vmem:[%s2361_s1 + $0x118] sm:$0xff]   ;;  %v1737_v56 = vld [vmem:[%s2361_s1 + $0x160] sm:$0xff]   ;;  %v1741_v60 = vld [vmem:[%s2361_s1 + $0x168] sm:$0xff]  }
  0x13   :  { %v1736_v55 = vld [vmem:[%s2361_s1 + $0x198] sm:$0xff]   ;;  %v1738_v57 = vld [vmem:[%s2361_s1 + $0x1e0] sm:$0xff]   ;;  %v1742_v61 = vld [vmem:[%s2361_s1 + $0x1e8] sm:$0xff]  }
  0x14   :  { %1482 = vmatpush3.bf16.msra.mxu0 %v1707_v18  ;;  %v1739_v58 = vld [vmem:[%s2361_s1 + $0x120] sm:$0xff]   ;;  %v1743_v62 = vld [vmem:[%s2361_s1 + $0x128] sm:$0xff]   ;;  %v1745_v0 = vld [vmem:[%s2361_s1 + $0x170] sm:$0xff]  }
  0x15   :  { %1504 = vmatpush3.bf16.msra.mxu1 %v1708_v19  ;;  %1483 = vmatprep.subr.bf16.mxu0 %v1709_v20  ;;  %v1740_v59 = vld [vmem:[%s2361_s1 + $0x1a0] sm:$0xff]   ;;  %v1744_v63 = vld [vmem:[%s2361_s1 + $0x1a8] sm:$0xff]   ;;  %v1746_v1 = vld [vmem:[%s2361_s1 + $0x1f0] sm:$0xff]  }
  0x16   :  { %1505 = vmatprep.subr.bf16.mxu1 %v1710_v21  ;;  %v1747_v2 = vld [vmem:[%s2361_s1 + $0x130] sm:$0xff]   ;;  %v1749_v4 = vld [vmem:[%s2361_s1 + $0x178] sm:$0xff]   ;;  %v54_v8 = vld [vmem:[%s2360_s0 + $0x28] sm:$0xff] }
  0x17   :  { %v1748_v3 = vld [vmem:[%s2361_s1 + $0x1b0] sm:$0xff]   ;;  %v1750_v5 = vld [vmem:[%s2361_s1 + $0x1f8] sm:$0xff]   ;;  %v62_v10 = vpack.c.bf16 %v54_v8, %v54_v8  ;;  %v53_v12 = vld [vmem:[%s2360_s0 + $0x20] sm:$0xff] }
  0x18   :  { %1484 = vmatpush3.bf16.msra.mxu0 %v1711_v22  ;;  %v1751_v6 = vld [vmem:[%s2361_s1 + $0x138] sm:$0xff]   ;;  %v55_v13 = vld [vmem:[%s2360_s0 + $0x30] sm:$0xff] }
  0x19   :  { %1506 = vmatpush3.bf16.msra.mxu1 %v1712_v23  ;;  %1485 = vmatprep.subr.bf16.mxu0 %v1713_v24  ;;  %v1752_v7 = vld [vmem:[%s2361_s1 + $0x1b8] sm:$0xff]  }
  0x1a   :  { %1507 = vmatprep.subr.bf16.mxu1 %v1714_v25  ;;  %v56_v9 = vld [vmem:[%s2360_s0 + $0x38] sm:$0xff] }
  0x1b   :  { %v64_v11 = vpack.c.bf16 %v56_v9, %v56_v9 }
  0x1c   :  { %1486 = vmatpush3.bf16.msra.mxu0 %v1715_v26 }
  0x1d   :  { %1508 = vmatpush3.bf16.msra.mxu1 %v1716_v27  ;;  %1487 = vmatprep.subr.bf16.mxu0 %v1717_v28 }
  0x1e   :  { %1509 = vmatprep.subr.bf16.mxu1 %v1718_v29 }
  0x20   :  { %1488 = vmatpush3.bf16.msra.mxu0 %v1719_v30 }
  0x21   :  { %1510 = vmatpush3.bf16.msra.mxu1 %v1720_v31  ;;  %1517 = vmatprep.subr.bf16.mxu0 %v1721_v40 }
  0x22   :  { %1539 = vmatprep.subr.bf16.mxu1 %v1722_v41 }
  0x23   :  { %617 = vmatmul.mubr.bf16.vlgmr.msra.gmra.mrb[0].mxu0 %v57_v37 }
  0x24   :  { %657 = vmatmul.mubr.bf16.vlgmr.msra.gmra.mrb[0].mxu1 %v59_v39  ;;  %1518 = vmatpush3.bf16.msra.mxu0 %v1723_v42 }
  0x25   :  { %1540 = vmatpush3.bf16.msra.mxu1 %v1724_v43  ;;  %1519 = vmatprep.subr.bf16.mxu0 %v1725_v44 }
  0x26   :  { %1541 = vmatprep.subr.bf16.mxu1 %v1726_v45 }
  0x28   :  { %1520 = vmatpush3.bf16.msra.mxu0 %v1727_v46 }
  0x29   :  { %1542 = vmatpush3.bf16.msra.mxu1 %v1728_v47  ;;  %1521 = vmatprep.subr.bf16.mxu0 %v1729_v48 }
  0x2a   :  { %1543 = vmatprep.subr.bf16.mxu1 %v1730_v49 }
  0x2c   :  { %1522 = vmatpush3.bf16.msra.mxu0 %v1731_v50 }
  0x2d   :  { %1544 = vmatpush3.bf16.msra.mxu1 %v1732_v51  ;;  %1523 = vmatprep.subr.bf16.mxu0 %v1733_v52 }
  0x2e   :  { %1545 = vmatprep.subr.bf16.mxu1 %v1734_v53 }
  0x30   :  { %1524 = vmatpush3.bf16.msra.mxu0 %v1735_v54 }
  0x31   :  { %1546 = vmatpush3.bf16.msra.mxu1 %v1736_v55  ;;  %1525 = vmatprep.subr.bf16.mxu0 %v1737_v56 }
  0x32   :  { %1547 = vmatprep.subr.bf16.mxu1 %v1738_v57 }
  0x34   :  { %1526 = vmatpush3.bf16.msra.mxu0 %v1739_v58 }
  0x35   :  { %1548 = vmatpush3.bf16.msra.mxu1 %v1740_v59  ;;  %1527 = vmatprep.subr.bf16.mxu0 %v1741_v60 }
  0x36   :  { %1549 = vmatprep.subr.bf16.mxu1 %v1742_v61 }
  0x38   :  { %1528 = vmatpush3.bf16.msra.mxu0 %v1743_v62 }
  0x39   :  { %1550 = vmatpush3.bf16.msra.mxu1 %v1744_v63  ;;  %1529 = vmatprep.subr.bf16.mxu0 %v1745_v0 }
  0x3a   :  { %1551 = vmatprep.subr.bf16.mxu1 %v1746_v1 }
  0x3c   :  { %1530 = vmatpush3.bf16.msra.mxu0 %v1747_v2 }
  0x3d   :  { %1552 = vmatpush3.bf16.msra.mxu1 %v1748_v3  ;;  %1531 = vmatprep.subr.bf16.mxu0 %v1749_v4 }
  0x3e   :  { %1553 = vmatprep.subr.bf16.mxu1 %v1750_v5 }
  0x40   :  { %1532 = vmatpush3.bf16.msra.mxu0 %v1751_v6 }
  0x41   :  { %23 = vsyncpa [#allocation8], 0  ;;  %1554 = vmatpush3.bf16.msra.mxu1 %v1752_v7  ;;  %v61_v14 = vpack.c.bf16 %v53_v12, %v53_v12  ;;  %v63_v15 = vpack.c.bf16 %v55_v13, %v55_v13  ;;  %696 = vmatprep.mubr.bf16.mxu0 %v62_v10  ;;  %v830_v16 = vld [vmem:[%s2365_s5] sm:$0xff]  ;;  %v831_v17 = vld [vmem:[%s2365_s5 + $0x8] sm:$0xff]  ;;  %v1849_v21 = vmov 0.0|0.0   ;;  %vm1850_vm0 = vmmov 0  }
  0x42   :  { %736 = vmatprep.mubr.bf16.mxu1 %v64_v11  ;;  %v745_v18 = vld [vmem:[%s2363_s3] sm:$0xff]  ;;  %v1652_v19 = vpack.c.bf16 %v831_v17, %v830_v16  ;;  %v746_v20 = vld [vmem:[%s2363_s3 + $0x8] sm:$0xff]  ;;  %1651 = vmatprep.subr.bf16.mxu1 %v1849_v21  ;;  %v832_v23 = vld [vmem:[%s2365_s5 + $0x10] sm:$0xff]  ;;  %v1851_v29 = vmov 0.0   ;;  %vm756_vm1 = vcmask 261120   ;;  %s1853_s28 = smov [#allocation4]  }
  0x43   :  { %697 = vmatmul.mubr.bf16.vlgmr.msra.gmra.mrb[4].mxu0 %v61_v14  ;;  %1645 = vmatprep.subr.bf16.mxu0 %v1849_v21  ;;  %v1646_v22 = vpack.c.bf16 %v746_v20, %v745_v18  ;;  %v833_v24 = vld [vmem:[%s2365_s5 + $0x18] sm:$0xff]  ;;  %v747_v25 = vld [vmem:[%s2363_s3 + $0x10] sm:$0xff]  ;;  %v1383_v32 = vld [vmem:[%s2362_s2] ss:$0 sm:$0xff] }
  0x44   :  { %737 = vmatmul.mubr.bf16.vlgmr.msra.gmra.mrb[4].mxu1 %v63_v15  ;;  %v1655_v26 = vpack.c.bf16 %v833_v24, %v832_v23  ;;  %v748_v27 = vld [vmem:[%s2363_s3 + $0x18] sm:$0xff]  ;;  %1596 = vmatprep.mubr.msk.f32.mxu0 %vm1850_vm0, %v1851_v29  ;;  %v917_v54 = vld [vmem:[%s2368_s8] sm:$0xff]  ;;  %v918_v55 = vld [vmem:[%s2368_s8 + $0x8] sm:$0xff] }
  0x45   :  { %1653 = vmatpush3.bf16.msra.mxu1 %v1652_v19  ;;  %1647 = vmatpush3.bf16.msra.mxu0 %v1646_v22  ;;  %v1649_v28 = vpack.c.bf16 %v748_v27, %v747_v25  ;;  %v1658_v57 = vpack.c.bf16 %v918_v55, %v917_v54  ;;  %v919_v59 = vld [vmem:[%s2368_s8 + $0x10] sm:$0xff]  ;;  %v920_v60 = vld [vmem:[%s2368_s8 + $0x18] sm:$0xff]  ;;  %v921_v62 = vld [vmem:[%s2368_s8 + $0x20] sm:$0xff] }
  0x46   :  { %1654 = vmatprep.subr.bf16.mxu1 %v1849_v21  ;;  %1648 = vmatprep.subr.bf16.mxu0 %v1849_v21  ;;  %v1661_v61 = vpack.c.bf16 %v920_v60, %v919_v59  ;;  %v922_v63 = vld [vmem:[%s2368_s8 + $0x28] sm:$0xff]  ;;  %v923_v1 = vld [vmem:[%s2368_s8 + $0x30] sm:$0xff]  ;;  %v924_v2 = vld [vmem:[%s2368_s8 + $0x38] sm:$0xff] }
  0x47   :  { %1607 = vmatprep.mubr.msk.f32.mxu1 %vm1850_vm0, %v1851_v29  ;;  %v1664_v0 = vpack.c.bf16 %v922_v63, %v921_v62  ;;  %v1667_v3 = vpack.c.bf16 %v924_v2, %v923_v1  ;;  %v925_v4 = vld [vmem:[%s2368_s8 + $0x40] sm:$0xff]  ;;  %v926_v5 = vld [vmem:[%s2368_s8 + $0x48] sm:$0xff]  ;;  %v927_v7 = vld [vmem:[%s2368_s8 + $0x50] sm:$0xff] }
  0x48   :  { %v1670_v6 = vpack.c.bf16 %v926_v5, %v925_v4  ;;  %v928_v8 = vld [vmem:[%s2368_s8 + $0x58] sm:$0xff]  ;;  %v929_v10 = vld [vmem:[%s2368_s8 + $0x60] sm:$0xff]  ;;  %v930_v11 = vld [vmem:[%s2368_s8 + $0x68] sm:$0xff] }
  0x49   :  { %1656 = vmatpush3.bf16.msra.mxu1 %v1655_v26  ;;  %1650 = vmatpush3.bf16.msra.mxu0 %v1649_v28  ;;  %v1673_v9 = vpack.c.bf16 %v928_v8, %v927_v7  ;;  %v1676_v12 = vpack.c.bf16 %v930_v11, %v929_v10  ;;  %v931_v13 = vld [vmem:[%s2368_s8 + $0x70] sm:$0xff]  ;;  %v932_v14 = vld [vmem:[%s2368_s8 + $0x78] sm:$0xff]  ;;  %v1012_v16 = vld [vmem:[%s2370_s10] sm:$0xff] }
  0x4a   :  { %1657 = vmatprep.subr.bf16.mxu0 %v1849_v21  ;;  %v1679_v15 = vpack.c.bf16 %v932_v14, %v931_v13  ;;  %v1016_v17 = vld [vmem:[%s2370_s10 + $0x20] sm:$0xff]  ;;  %v1015_v60 = vld [vmem:[%s2370_s10 + $0x18] sm:$0xff] }
  0x4b   :  { %v1453_v18 = vcombine.low %v1012_v16, %v1016_v17  ;;  %v1454_v19 = vcombine.high %v1012_v16, %v1016_v17  ;;  %v1448_v20 = vld [vmem:[%s2364_s4] ss:$0 sm:$0xff]  ;;  %v1027_v1 = vld [vmem:[%s2370_s10 + $0x78] sm:$0xff] }
  0x4d   :  { %1153 = vmatprep.subr.bf16.mxu1 %v1454_v19 }
  0xf6   :  { %v1489_v30 = vpop.f32.mrb[0].mxu0 }
  0xf7   :  { %v1511_v31 = vpop.f32.mrb[0].mxu1  ;;  %v1490_v33 = vpop.f32.mrb[1].mxu0 }
  0xf8   :  { %v1512_v34 = vpop.f32.mrb[1].mxu1  ;;  %v1491_v35 = vadd.f32 %v1490_v33, %v1489_v30  ;;  %v1492_v37 = vpop.f32.mrb[2].mxu0  ;;  %v914_v30 = vld [vmem:[%s2367_s7] sm:$0xff]  ;;  %s1344_s7 = sshll.u32 %s1853_s28, 4  ;;  %s1345_s7 = int_to_ptr.vmem [resolvable:$true] %s1344_s7 }
  0xf9   :  { %v1513_v36 = vadd.f32 %v1512_v34, %v1511_v31  ;;  %v1514_v38 = vpop.f32.mrb[2].mxu1  ;;  %v1493_v39 = vpop.f32.mrb[3].mxu0  ;;  %v1020_v34 = vld [vmem:[%s2370_s10 + $0x40] sm:$0xff]  ;;  %s1755_s29 = scalar_lea.vmem %s1345_s7, 128  ;;  %p1760_p1 = scmp.lt.s32.totalorder %s1345_s7, %s1345_s7 }
  0xfa   :  { %v1515_v40 = vpop.f32.mrb[3].mxu1  ;;  %v619_v41 = vadd.f32 %v1491_v35, %v1383_v32  ;;  %v1024_v35 = vld [vmem:[%s2370_s10 + $0x60] sm:$0xff]  ;;  %v1013_v38 = vld [vmem:[%s2370_s10 + $0x8] sm:$0xff]  ;;  %p1756_p0 = scmp.ne.s32.totalorder %s1345_s7, %s1755_s29  ;;  %p1761_p2 = scmp.lt.s32.totalorder %s1755_s29, %s1755_s29 }
  0xfb   :  { %v1461_v37 = vcombine.low %v1020_v34, %v1024_v35  ;;  %v1017_v39 = vld [vmem:[%s2370_s10 + $0x28] sm:$0xff]  ;;  %v1852_v40 = vmov 0  }
  0xfc   :  { %v659_v42 = vadd.f32 %v1513_v36, %v619_v41  ;;  %v1462_v36 = vcombine.high %v1020_v34, %v1024_v35  ;;  %v1455_v41 = vcombine.low %v1013_v38, %v1017_v39  ;;  %p1762_p3 = por %p1761_p2, %p1760_p1 }
  0xfe   :  { %p1763_p4 = pnand %p1762_p3, %p1756_p0 }
 0x116   :  { %v1533_v43 = vpop.f32.mrb[4].mxu0 }
 0x117   :  { %v1555_v44 = vpop.f32.mrb[4].mxu1  ;;  %v1534_v45 = vpop.f32.mrb[5].mxu0 }
 0x118   :  { %v1535_v46 = vadd.f32 %v1534_v45, %v1533_v43  ;;  %v1556_v47 = vpop.f32.mrb[5].mxu1  ;;  %v1536_v48 = vpop.f32.mrb[6].mxu0  ;;  %v1452_v43 = vld [vmem:[%s2369_s9] ss:$0 sm:$0xff] }
 0x119   :  { %v1557_v49 = vadd.f32 %v1556_v47, %v1555_v44  ;;  %v1558_v50 = vpop.f32.mrb[6].mxu1  ;;  %v1537_v51 = vpop.f32.mrb[7].mxu0  ;;  %v1021_v47 = vld [vmem:[%s2370_s10 + $0x48] sm:$0xff] }
 0x11a   :  { %v699_v52 = vadd.f32 %v1535_v46, %v659_v42  ;;  %v1559_v53 = vpop.f32.mrb[7].mxu1  ;;  %v1456_v42 = vcombine.high %v1013_v38, %v1017_v39  ;;  %v1025_v48 = vld [vmem:[%s2370_s10 + $0x68] sm:$0xff] }
 0x11b   :  { %v1464_v51 = vcombine.high %v1021_v47, %v1025_v48  ;;  %v1018_v53 = vld [vmem:[%s2370_s10 + $0x30] sm:$0xff]  ;;  %v1463_v54 = vcombine.low %v1021_v47, %v1025_v48 }
 0x11c   :  { %v739_v56 = vadd.f32 %v1557_v49, %v699_v52  ;;  %v1014_v52 = vld [vmem:[%s2370_s10 + $0x10] sm:$0xff] }
 0x11d   :  { %v1458_v55 = vcombine.high %v1014_v52, %v1018_v53 }
 0x11e   :  { %v744_v58 = vmax.f32 %v739_v56, 0.0  ;;  %v1022_v56 = vld [vmem:[%s2370_s10 + $0x50] sm:$0xff] }
 0x120   :  { %1597 = vmatmul.mubr.msk.f32.vlgmr.msra.gmra.mrb[8].mxu0 %vm756_vm1, %v744_v58  ;;  %1608 = vmatmul.mubr.msk.f32.vlgmr.msra.gmra.mrb[8].mxu1 %vm756_vm1, %v744_v58  ;;  %v1457_v58 = vcombine.low %v1014_v52, %v1018_v53 }
 0x121   :  { %1659 = vmatpush3.bf16.msra.mxu0 %v1658_v57  ;;  %1642 = vmatprep.mubr.msk.f32.mxu0 %vm1850_vm0, %v1851_v29  ;;  %v1026_v57 = vld [vmem:[%s2370_s10 + $0x70] sm:$0xff] }
 0x122   :  { %1660 = vmatprep.subr.bf16.mxu0 %v1849_v21  ;;  %1154 = vmatpush1.bf16.msra.mxu1 %v1453_v18  ;;  %v1466_v59 = vcombine.high %v1022_v56, %v1026_v57  ;;  %v1465_v62 = vcombine.low %v1022_v56, %v1026_v57 }
 0x123   :  { %1155 = vmatprep.subr.bf16.mxu1 %v1462_v36  ;;  %1185 = vmatprep.mubr.bf16.mxu1 %v1852_v40 }
 0x125   :  { %1662 = vmatpush3.bf16.msra.mxu0 %v1661_v61  ;;  %v1019_v61 = vld [vmem:[%s2370_s10 + $0x38] sm:$0xff] }
 0x126   :  { %1663 = vmatprep.subr.bf16.mxu0 %v1849_v21  ;;  %1156 = vmatpush1.bf16.msra.mxu1 %v1461_v37  ;;  %v1460_v63 = vcombine.high %v1015_v60, %v1019_v61  ;;  %v1459_v2 = vcombine.low %v1015_v60, %v1019_v61 }
 0x127   :  { %1194 = vmatprep.subr.bf16.mxu1 %v1456_v42 }
 0x129   :  { %1665 = vmatpush3.bf16.msra.mxu0 %v1664_v0  ;;  %v1023_v0 = vld [vmem:[%s2370_s10 + $0x58] sm:$0xff] }
 0x12a   :  { %1666 = vmatprep.subr.bf16.mxu0 %v1849_v21  ;;  %v1467_v4 = vcombine.low %v1023_v0, %v1027_v1 }
 0x12d   :  { %1668 = vmatpush3.bf16.msra.mxu0 %v1667_v3  ;;  %v1468_v3 = vcombine.high %v1023_v0, %v1027_v1 }
 0x12e   :  { %1669 = vmatprep.subr.bf16.mxu0 %v1849_v21 }
 0x131   :  { %1671 = vmatpush3.bf16.msra.mxu0 %v1670_v6 }
 0x132   :  { %1672 = vmatprep.subr.bf16.mxu0 %v1849_v21 }
 0x135   :  { %1674 = vmatpush3.bf16.msra.mxu0 %v1673_v9 }
 0x136   :  { %1675 = vmatprep.subr.bf16.mxu0 %v1849_v21 }
 0x139   :  { %1677 = vmatpush3.bf16.msra.mxu0 %v1676_v12 }
 0x13a   :  { %1678 = vmatprep.subr.bf16.mxu0 %v1849_v21  ;;  %v1450_v21 = vld [vmem:[%s2366_s6] ss:$0 sm:$0xff] }
 0x13d   :  { %1680 = vmatpush3.bf16.msra.mxu0 %v1679_v15 }
 0x1f3   :  { %v826_v22 = vpop.f32.mrb[8].mxu0  ;;  %v907_v23 = vpop.f32.mrb[8].mxu1 }
 0x1f4   :  { %v827_v24 = vadd.f32 %v1448_v20, %v826_v22  ;;  %v908_v25 = vadd.f32 %v1450_v21, %v907_v23  ;;  %v1598_v26 = vpop.f32.mrb[9].mxu0  ;;  %v1609_v27 = vpop.f32.mrb[9].mxu1 }
 0x1f6   :  { %1325 = vst [vmem:[#allocation4] sm:$0xff] %v827_v24  ;;  %v911_v28 = vmul.f32 0.5, %v908_v25  ;;  %1326 = vst [vmem:[#allocation6] sm:$0xff] %v908_v25 }
 0x1f8   :  { %v912_v29 = vmul.f32 1.442695, %v911_v28 }
 0x1fa   :  { %1753 = vpow2.f32 %v912_v29 }
 0x204   :  { %v1754_v31 = vpop.eup %1753 }
 0x205   :  { %v915_v32 = vmul.f32 %v1754_v31, %v914_v30 }
 0x207   :  { %v916_v33 = vadd.f32 %v915_v32, %v827_v24 }
 0x209   :  { %1643 = vmatmul.mubr.f32.vlgmr.msra.gmra.mrb[10].mxu0 %v916_v33  ;;  %1327 = vst [vmem:[#allocation7] sm:$0xff] %v916_v33 }
 0x2dc   :  { %v1006_v44 = vpop.f32.mrb[10].mxu0 }
 0x2dd   :  { %v1007_v45 = vadd.f32 %v1452_v43, %v1006_v44  ;;  %v1644_v46 = vpop.f32.mrb[11].mxu0 }
 0x2df   :  { %v1010_v49 = vmax.f32 %v1007_v45, 0.0 }
 0x2e1   :  { %v1011_v50 = vpack.c.bf16 %v1010_v49, %v1010_v49 }
 0x2e3   :  { %1469 = vmatmul.mubr.msk.bf16.vlgmr.msra.gmra.mrb[12].mxu1 %vm756_vm1, %v1011_v50 }
 0x2e4   :  { %1195 = vmatpush1.bf16.msra.mxu1 %v1455_v41  ;;  %1226 = vmatprep.mubr.bf16.mxu1 %v1852_v40 }
 0x2e5   :  { %1196 = vmatprep.subr.bf16.mxu1 %v1464_v51 }
 0x2e8   :  { %1197 = vmatpush1.bf16.msra.mxu1 %v1463_v54 }
 0x2e9   :  { %1235 = vmatprep.subr.bf16.mxu1 %v1458_v55 }
 0x2eb   :  { %1470 = vmatmul.mubr.msk.bf16.vlgmr.msra.gmra.mrb[16].mxu1 %vm756_vm1, %v1011_v50 }
 0x2ec   :  { %1236 = vmatpush1.bf16.msra.mxu1 %v1457_v58  ;;  %1267 = vmatprep.mubr.bf16.mxu1 %v1852_v40 }
 0x2ed   :  { %1237 = vmatprep.subr.bf16.mxu1 %v1466_v59 }
 0x2f0   :  { %1238 = vmatpush1.bf16.msra.mxu1 %v1465_v62 }
 0x2f1   :  { %1276 = vmatprep.subr.bf16.mxu1 %v1460_v63 }
 0x2f3   :  { %1471 = vmatmul.mubr.msk.bf16.vlgmr.msra.gmra.mrb[20].mxu1 %vm756_vm1, %v1011_v50 }
 0x2f4   :  { %1277 = vmatpush1.bf16.msra.mxu1 %v1459_v2  ;;  %1308 = vmatprep.mubr.bf16.mxu1 %v1852_v40 }
 0x2f5   :  { %1278 = vmatprep.subr.bf16.mxu1 %v1468_v3 }
 0x2f8   :  { %1279 = vmatpush1.bf16.msra.mxu1 %v1467_v4 }
 0x2fb   :  { %1472 = vmatmul.mubr.msk.bf16.vlgmr.msra.gmra.mrb[24].mxu1 %vm756_vm1, %v1011_v50 }
 0x2fc   :  { %1766 = shalt.err (!%p1763_p4)
}
 0x2fd   :  { %s1767_s16 = scalar_lea.hbm %s2373_s13, 128 }
 0x2fe   :  { %p1768_p5 = scmp.ne.s32.totalorder %s2373_s13, %s1767_s16  ;;  %p1771_p6 = scmp.lt.u32.totalorder %s1767_s16, %s2373_s13 }
 0x300   :  { %p1773_p7 = pnand %p1771_p6, %p1768_p5 }
 0x302   :  { %1776 = shalt.err (!%p1773_p7)
}
 0x303   :  { %1347 = dma.vmem_to_hbm [thread:$0]  %s1345_s7, 128, %s2373_s13, [#allocation5]  }
 0x304   :  { %s1854_s22 = smov [#allocation6]   ;;  %s1855_s23 = smov [#allocation7]  }
 0x305   :  { %s1354_s9 = sshll.u32 %s1854_s22, 4  ;;  %s1364_s24 = sshll.u32 %s1855_s23, 4  ;;  %s1355_s9 = int_to_ptr.vmem [resolvable:$true] %s1354_s9  ;;  %s1365_s24 = int_to_ptr.vmem [resolvable:$true] %s1364_s24 }
 0x306   :  { %s1777_s25 = scalar_lea.vmem %s1355_s9, 128  ;;  %p1782_p9 = scmp.lt.s32.totalorder %s1355_s9, %s1355_s9 }
 0x307   :  { %p1778_p8 = scmp.ne.s32.totalorder %s1355_s9, %s1777_s25  ;;  %p1783_p10 = scmp.lt.s32.totalorder %s1777_s25, %s1777_s25 }
 0x309   :  { %p1784_p11 = por %p1783_p10, %p1782_p9 }
 0x30b   :  { %p1785_p12 = pnand %p1784_p11, %p1778_p8 }
 0x30d   :  { %1788 = shalt.err (!%p1785_p12)
}
 0x30e   :  { %s1789_s26 = scalar_lea.hbm %s2374_s14, 128 }
 0x30f   :  { %p1790_p13 = scmp.ne.s32.totalorder %s2374_s14, %s1789_s26  ;;  %p1793_p0 = scmp.lt.u32.totalorder %s1789_s26, %s2374_s14 }
 0x311   :  { %p1795_p1 = pnand %p1793_p0, %p1790_p13 }
 0x313   :  { %1798 = shalt.err (!%p1795_p1)
}
 0x314   :  { %1357 = dma.vmem_to_hbm [thread:$0]  %s1355_s9, 128, %s2374_s14, [#allocation5]  }
 0x315   :  { %s1799_s27 = scalar_lea.vmem %s1365_s24, 128  ;;  %p1804_p3 = scmp.lt.s32.totalorder %s1365_s24, %s1365_s24 }
 0x316   :  { %p1800_p2 = scmp.ne.s32.totalorder %s1365_s24, %s1799_s27  ;;  %p1805_p4 = scmp.lt.s32.totalorder %s1799_s27, %s1799_s27 }
 0x318   :  { %p1806_p5 = por %p1805_p4, %p1804_p3 }
 0x31a   :  { %p1807_p6 = pnand %p1806_p5, %p1800_p2 }
 0x31c   :  { %1810 = shalt.err (!%p1807_p6)
}
 0x31d   :  { %s1811_s29 = scalar_lea.hbm %s2375_s15, 128 }
 0x31e   :  { %p1812_p7 = scmp.ne.s32.totalorder %s2375_s15, %s1811_s29  ;;  %p1815_p8 = scmp.lt.u32.totalorder %s1811_s29, %s2375_s15 }
 0x320   :  { %p1817_p9 = pnand %p1815_p8, %p1812_p7 }
 0x322   :  { %1820 = shalt.err (!%p1817_p9)
}
 0x323   :  { %1367 = dma.vmem_to_hbm [thread:$0]  %s1365_s24, 128, %s2375_s15, [#allocation8]   ;;  %v1030_v5 = vlaneseq  ;;  %v1028_v8 = vld [vmem:[%s2371_s11] sm:$0xff] }
 0x324   :  { %s1856_s11 = smov [#allocation2]  }
 0x325   :  { %v1031_v6 = vshrl.u32 %v1030_v5, 7  ;;  %s1334_s15 = sshll.u32 %s1856_s11, 4  ;;  %s1335_s15 = int_to_ptr.vmem [resolvable:$true] %s1334_s15 }
 0x326   :  { %s1821_s20 = scalar_lea.vmem %s1335_s15, 1024  ;;  %p1826_p11 = scmp.lt.s32.totalorder %s1335_s15, %s1335_s15 }
 0x327   :  { %v1032_v7 = vsub.s32 0, %v1031_v6  ;;  %v1036_v9 = vsub.s32 1, %v1031_v6  ;;  %v1040_v15 = vsub.s32 2, %v1031_v6  ;;  %v1044_v18 = vsub.s32 3, %v1031_v6  ;;  %p1822_p10 = scmp.ne.s32.totalorder %s1335_s15, %s1821_s20  ;;  %p1827_p12 = scmp.lt.s32.totalorder %s1821_s20, %s1821_s20 }
 0x328   :  { %v1048_v25 = vsub.s32 4, %v1031_v6  ;;  %v1052_v28 = vsub.s32 5, %v1031_v6  ;;  %v1056_v35 = vsub.s32 6, %v1031_v6  ;;  %v1060_v38 = vsub.s32 7, %v1031_v6 }
 0x329   :  { %v1033_v10 = vrot.slane %v1028_v8, %v1032_v7  ;;  %v1037_v11 = vrot.slane %v1028_v8, %v1036_v9  ;;  %v1041_v20 = vrot.slane %v1028_v8, %v1040_v15  ;;  %v1045_v21 = vrot.slane %v1028_v8, %v1044_v18  ;;  %p1828_p13 = por %p1827_p12, %p1826_p11 }
 0x32a   :  { %v1049_v30 = vrot.slane %v1028_v8, %v1048_v25  ;;  %v1053_v31 = vrot.slane %v1028_v8, %v1052_v28  ;;  %v1057_v40 = vrot.slane %v1028_v8, %v1056_v35  ;;  %v1061_v41 = vrot.slane %v1028_v8, %v1060_v38 }
 0x32b   :  { %p1829_p0 = pnand %p1828_p13, %p1822_p10 }
 0x3b6   :  { %v1187_v12 = vpop.f32.mrb[12].mxu1 }
 0x3b7   :  { %v1188_v13 = vadd.f32 %v1187_v12, %v1033_v10  ;;  %v1189_v14 = vpop.f32.mrb[13].mxu1 }
 0x3b8   :  { %v1190_v16 = vadd.f32 %v1189_v14, %v1037_v11  ;;  %v1191_v17 = vpop.f32.mrb[14].mxu1 }
 0x3b9   :  { %1317 = vst [vmem:[#allocation2] sm:$0xff] %v1188_v13  ;;  %v1192_v19 = vpop.f32.mrb[15].mxu1 }
 0x3ba   :  { %1318 = vst [vmem:[#allocation2 + $0x8] sm:$0xff] %v1190_v16 }
 0x3be   :  { %v1228_v22 = vpop.f32.mrb[16].mxu1 }
 0x3bf   :  { %v1229_v23 = vadd.f32 %v1228_v22, %v1041_v20  ;;  %v1230_v24 = vpop.f32.mrb[17].mxu1 }
 0x3c0   :  { %v1231_v26 = vadd.f32 %v1230_v24, %v1045_v21  ;;  %v1232_v27 = vpop.f32.mrb[18].mxu1 }
 0x3c1   :  { %1319 = vst [vmem:[#allocation2 + $0x10] sm:$0xff] %v1229_v23  ;;  %v1233_v29 = vpop.f32.mrb[19].mxu1 }
 0x3c2   :  { %1320 = vst [vmem:[#allocation2 + $0x18] sm:$0xff] %v1231_v26 }
 0x3c6   :  { %v1269_v32 = vpop.f32.mrb[20].mxu1 }
 0x3c7   :  { %v1270_v33 = vadd.f32 %v1269_v32, %v1049_v30  ;;  %v1271_v34 = vpop.f32.mrb[21].mxu1 }
 0x3c8   :  { %v1272_v36 = vadd.f32 %v1271_v34, %v1053_v31  ;;  %v1273_v37 = vpop.f32.mrb[22].mxu1 }
 0x3c9   :  { %1321 = vst [vmem:[#allocation2 + $0x20] sm:$0xff] %v1270_v33  ;;  %v1274_v39 = vpop.f32.mrb[23].mxu1 }
 0x3ca   :  { %1322 = vst [vmem:[#allocation2 + $0x28] sm:$0xff] %v1272_v36 }
 0x3ce   :  { %v1310_v42 = vpop.f32.mrb[24].mxu1 }
 0x3cf   :  { %v1311_v43 = vadd.f32 %v1310_v42, %v1057_v40  ;;  %v1312_v44 = vpop.f32.mrb[25].mxu1 }
 0x3d0   :  { %v1313_v45 = vadd.f32 %v1312_v44, %v1061_v41  ;;  %v1314_v46 = vpop.f32.mrb[26].mxu1 }
 0x3d1   :  { %1323 = vst [vmem:[#allocation2 + $0x30] sm:$0xff] %v1311_v43  ;;  %v1315_v47 = vpop.f32.mrb[27].mxu1 }
 0x3d2   :  { %1324 = vst [vmem:[#allocation2 + $0x38] sm:$0xff] %v1313_v45 }
 0x3d3   :  { %1832 = shalt.err (!%p1829_p0)
}
 0x3d4   :  { %s1833_s9 = scalar_lea.hbm %s2372_s12, 1024 }
 0x3d5   :  { %p1834_p1 = scmp.ne.s32.totalorder %s2372_s12, %s1833_s9  ;;  %p1837_p2 = scmp.lt.u32.totalorder %s1833_s9, %s2372_s12 }
 0x3d7   :  { %p1839_p3 = pnand %p1837_p2, %p1834_p1 }
 0x3d9   :  { %1842 = shalt.err (!%p1839_p3)
}
 0x3da   :  { %1337 = dma.vmem_to_hbm [thread:$0]  %s1335_s15, 1024, %s2372_s12, [#allocation3]  }
 0x3db   :  { %1843 = dma.done.wait [#allocation3], 1024  }
 0x3dc   :  { %1844 = vsyncadd [#allocation3], 4294966272 }
 0x3dd   :  { %1845 = dma.done.wait [#allocation5], 256  }
 0x3de   :  { %1846 = vsyncadd [#allocation5], 4294967040 }
 0x3df   :  { %1847 = dma.done.wait [#allocation8], 128  }
 0x3e0   :  { %1848 = vsyncadd [#allocation8], 4294967168 }
 0x3e1   :  { %1380 = vsyncpa [#allocation3], 1 }
 0x3e2   :  { %1381 = vsyncpa [#allocation5], 1 }
 0x3e3   :  { %1382 = vsyncpa [#allocation8], 1 }

</bundles_post_ra>
